<compile_context>
chip_gen: v7x
topology: tpu7x:2x2x1
jax: 0.10.0
libtpu: 0.0.40
codegen_flags: <defaults>
</compile_context>

<pallas_src>
import jax
import jax.numpy as jnp
from jax.experimental import pallas as pl
from jax.experimental.pallas import tpu as pltpu

_HIDDEN = 200        # fixed by the PyTorch module
_HIDDEN_PAD = 256    # lane-aligned hidden width (zero padded; exact: ReLU(0)=0)
_LANE = 128
_NEG_BIG = -1e30     # bias for dead output columns -> exp() == 0 in softmax


def _round_up(n, m):
    return ((n + m - 1) // m) * m


def _mlp_softmax_kernel(x_ref, w1_ref, b1_ref, w2_ref, b2_ref, w3_ref, b3_ref,
                        o_ref):
    """softmax(relu(relu(x@W1+b1)@W2+b2)@W3+b3, axis=-1) for one batch tile."""
    # Layer 1 (dropout1 = identity in eval mode). MXU accumulates in f32; the
    # bias add / ReLU stay in f32 and we recast only for the next MXU pass.
    h1 = jnp.dot(x_ref[...], w1_ref[...], preferred_element_type=jnp.float32)
    h1 = jnp.maximum(h1 + b1_ref[...], 0.0).astype(w2_ref.dtype)

    # Layer 2 (dropout2 = identity in eval mode).
    h2 = jnp.dot(h1, w2_ref[...], preferred_element_type=jnp.float32)
    h2 = jnp.maximum(h2 + b2_ref[...], 0.0).astype(w3_ref.dtype)

    # Layer 3 + softmax over the lane-dense (padded) class axis. Padded
    # columns carry a -1e30 bias, so they contribute 0 to the denominator.
    logits = jnp.dot(h2, w3_ref[...], preferred_element_type=jnp.float32)
    logits = logits + b3_ref[...]
    m = jnp.max(logits, axis=-1, keepdims=True)
    e = jnp.exp(logits - m)
    denom = jnp.sum(e, axis=-1, keepdims=True)
    o_ref[...] = e * pl.reciprocal(denom, approx=True)


def _pad2(a, rows, cols, fill=0.0):
    return jnp.pad(a, ((0, rows - a.shape[0]), (0, cols - a.shape[1])),
                   constant_values=fill)


def herg_classifier_forward(x, params, *, tile_b=256,
                            compute_dtype=jnp.bfloat16):
    """Fused, batch-tiled forward pass of hERGClassifier (eval semantics)."""
    w1, b1, w2, b2, w3, b3 = params            # weights stored as (in, out)
    batch, in_dim = x.shape
    out_dim = w3.shape[1]

    # Lane-aligned feature widths; 8-aligned batch tile (cap at actual batch).
    in_pad = _round_up(max(in_dim, _LANE), _LANE)
    out_pad = _round_up(max(out_dim, _LANE), _LANE)
    tile_b_eff = _round_up(min(tile_b, _round_up(batch, 8)), 8)
    batch_pad = _round_up(batch, tile_b_eff)
    grid = (batch_pad // tile_b_eff,)

    # Pad + cast operands. Input/hidden zero padding is exact; output padding
    # is neutralized through the -1e30 bias.
    xp = _pad2(x, batch_pad, in_pad).astype(compute_dtype)
    w1p = _pad2(w1, in_pad, _HIDDEN_PAD).astype(compute_dtype)
    w2p = _pad2(w2, _HIDDEN_PAD, _HIDDEN_PAD).astype(compute_dtype)
    w3p = _pad2(w3, _HIDDEN_PAD, out_pad).astype(compute_dtype)
    b1p = _pad2(b1, 1, _HIDDEN_PAD).astype(jnp.float32)
    b2p = _pad2(b2, 1, _HIDDEN_PAD).astype(jnp.float32)
    b3p = _pad2(b3, 1, out_pad, fill=_NEG_BIG).astype(jnp.float32)

    bytes_in = sum(int(a.size) * a.dtype.itemsize
                   for a in (xp, w1p, b1p, w2p, b2p, w3p, b3p))
    bytes_out = batch_pad * out_pad * 4
    cost = pl.CostEstimate(
        flops=2 * batch_pad * (in_pad * _HIDDEN_PAD
                               + _HIDDEN_PAD * _HIDDEN_PAD
                               + _HIDDEN_PAD * out_pad),
        transcendentals=batch_pad * (out_pad + 1),
        bytes_accessed=bytes_in + bytes_out,
    )

    # Weights/biases: constant block index -> VMEM-resident across the grid.
    resident = lambda shape: pl.BlockSpec(shape, lambda i: (0, 0))

    out = pl.pallas_call(
        _mlp_softmax_kernel,
        out_shape=jax.ShapeDtypeStruct((batch_pad, out_pad), jnp.float32),
        grid=grid,
        in_specs=[
            pl.BlockSpec((tile_b_eff, in_pad), lambda i: (i, 0)),
            resident(w1p.shape), resident(b1p.shape),
            resident(w2p.shape), resident(b2p.shape),
            resident(w3p.shape), resident(b3p.shape),
        ],
        out_specs=pl.BlockSpec((tile_b_eff, out_pad), lambda i: (i, 0)),
        compiler_params=pltpu.CompilerParams(
            dimension_semantics=("parallel",)),
        cost_estimate=cost,
    )(xp, w1p, b1p, w2p, b2p, w3p, b3p)

    return out[:batch, :out_dim]


def init_params(key, input_size, output_size):
    """Kaiming-normal (relu gain) weights, zero biases, fp32 master copies.

    PyTorch Linear weights are (out, in); we store the transpose (in, out)
    so the kernel multiplies x @ W directly.
    """
    k1, k2, k3 = jax.random.split(key, 3)

    def kaiming(k, fan_in, fan_out):
        std = jnp.sqrt(2.0 / fan_in)
        w = jax.random.normal(k, (fan_out, fan_in), dtype=jnp.float32) * std
        return w.T

    w1 = kaiming(k1, input_size, _HIDDEN)
    w2 = kaiming(k2, _HIDDEN, _HIDDEN)
    w3 = kaiming(k3, _HIDDEN, output_size)
    b1 = jnp.zeros((1, _HIDDEN), jnp.float32)
    b2 = jnp.zeros((1, _HIDDEN), jnp.float32)
    b3 = jnp.zeros((1, output_size), jnp.float32)
    return (w1, b1, w2, b2, w3, b3)


def reference_forward(x, params, compute_dtype=jnp.float32):
    """Plain-JAX reference of the PyTorch eval-mode forward (optionally
    mirroring the kernel's bf16 MXU inputs with f32 accumulation)."""
    w1, b1, w2, b2, w3, b3 = params
    cd = compute_dtype
    mm = lambda a, b: jnp.dot(a.astype(cd), b.astype(cd),
                              preferred_element_type=jnp.float32)
    h1 = jnp.maximum(mm(x, w1) + b1, 0.0)
    h2 = jnp.maximum(mm(h1, w2) + b2, 0.0)
    return jax.nn.softmax(mm(h2, w3) + b3, axis=1)


if __name__ == "__main__":
    key = jax.random.PRNGKey(0)
    kx, kp = jax.random.split(key)

    batch = 13           # deliberately ragged: exercises batch padding
    input_size = 200     # fingerprint length (ragged -> padded to 256 lanes)
    output_size = 2      # binary hERG blocker classifier

    x = jax.random.normal(kx, (batch, input_size), dtype=jnp.float32)
    params = init_params(kp, input_size, output_size)

    # tile_b=8 -> grid of 2 batch tiles at this toy size (production would use
    # the default 256-row tile).
    out = herg_classifier_forward(x, params, tile_b=8)
    out = jax.block_until_ready(out)

    ref_matched = reference_forward(x, params, compute_dtype=jnp.bfloat16)
    ref_f32 = reference_forward(x, params, compute_dtype=jnp.float32)

    assert out.shape == (batch, output_size)
    assert bool(jnp.all(jnp.isfinite(out))), "non-finite outputs"
    assert jnp.allclose(jnp.sum(out, axis=1), 1.0, atol=2e-2), \
        "softmax rows must sum to 1"
    assert jnp.allclose(out, ref_matched, atol=1e-2), \
        "mismatch vs matched-precision (bf16 MXU) reference"
    assert jnp.allclose(out, ref_f32, atol=5e-2), \
        "mismatch vs fp32 reference"

    print("KERNEL_OK")
</pallas_src>

<mosaic_0001>
module attributes {stable_mosaic.version = 11 : i64} {
  func.func @_mlp_softmax_kernel(%arg0: i32, %arg1: memref<8x256xbf16, #tpu.memory_space<vmem>>, %arg2: memref<256x256xbf16, #tpu.memory_space<vmem>>, %arg3: memref<1x256xf32, #tpu.memory_space<vmem>>, %arg4: memref<256x256xbf16, #tpu.memory_space<vmem>>, %arg5: memref<1x256xf32, #tpu.memory_space<vmem>>, %arg6: memref<256x128xbf16, #tpu.memory_space<vmem>>, %arg7: memref<1x128xf32, #tpu.memory_space<vmem>>, %arg8: memref<8x128xf32, #tpu.memory_space<vmem>>) attributes {dimension_semantics = [#tpu.dimension_semantics<parallel>], iteration_bounds = array<i64: 2>, scalar_prefetch = 0 : i64, scratch_operands = 0 : i64, tpu.core_type = #tpu.core_type<tc>, window_params = [{transform_indices = @transform_0, window_bounds = array<i64: 8, 256>}, {pipeline_mode = #tpu.pipeline_mode<synchronous>, transform_indices = @transform_1, window_bounds = array<i64: 256, 256>}, {pipeline_mode = #tpu.pipeline_mode<synchronous>, transform_indices = @transform_2, window_bounds = array<i64: 1, 256>}, {pipeline_mode = #tpu.pipeline_mode<synchronous>, transform_indices = @transform_3, window_bounds = array<i64: 256, 256>}, {pipeline_mode = #tpu.pipeline_mode<synchronous>, transform_indices = @transform_4, window_bounds = array<i64: 1, 256>}, {pipeline_mode = #tpu.pipeline_mode<synchronous>, transform_indices = @transform_5, window_bounds = array<i64: 256, 128>}, {pipeline_mode = #tpu.pipeline_mode<synchronous>, transform_indices = @transform_6, window_bounds = array<i64: 1, 128>}, {transform_indices = @transform_7, window_bounds = array<i64: 8, 128>}]} {
    %c0 = arith.constant 0 : index
    %c0_0 = arith.constant 0 : index
    %0 = vector.load %arg1[%c0, %c0_0] : memref<8x256xbf16, #tpu.memory_space<vmem>>, vector<8x256xbf16>
    %c0_1 = arith.constant 0 : index
    %c0_2 = arith.constant 0 : index
    %1 = vector.load %arg2[%c0_1, %c0_2] : memref<256x256xbf16, #tpu.memory_space<vmem>>, vector<256x256xbf16>
    %cst = arith.constant dense<0.000000e+00> : vector<8x256xf32>
    %2 = tpu.matmul %0, %1, %cst {dimension_numbers = #tpu.dot_dimension_numbers<[1], [0], [0], [1], [0, 0, 1, 1], [], []>} : vector<8x256xbf16>, vector<256x256xbf16>, vector<8x256xf32> -> vector<8x256xf32>
    %c0_3 = arith.constant 0 : index
    %c0_4 = arith.constant 0 : index
    %3 = vector.load %arg3[%c0_3, %c0_4] : memref<1x256xf32, #tpu.memory_space<vmem>>, vector<1x256xf32>
    %4 = vector.broadcast %3 : vector<1x256xf32> to vector<8x256xf32>
    %5 = arith.addf %2, %4 : vector<8x256xf32>
    %cst_5 = arith.constant 0.000000e+00 : f32
    %6 = vector.broadcast %cst_5 : f32 to vector<8x256xf32>
    %7 = arith.maximumf %5, %6 : vector<8x256xf32>
    %8 = arith.truncf %7 : vector<8x256xf32> to vector<8x256xbf16>
    %c0_6 = arith.constant 0 : index
    %c0_7 = arith.constant 0 : index
    %9 = vector.load %arg4[%c0_6, %c0_7] : memref<256x256xbf16, #tpu.memory_space<vmem>>, vector<256x256xbf16>
    %cst_8 = arith.constant dense<0.000000e+00> : vector<8x256xf32>
    %10 = tpu.matmul %8, %9, %cst_8 {dimension_numbers = #tpu.dot_dimension_numbers<[1], [0], [0], [1], [0, 0, 1, 1], [], []>} : vector<8x256xbf16>, vector<256x256xbf16>, vector<8x256xf32> -> vector<8x256xf32>
    %c0_9 = arith.constant 0 : index
    %c0_10 = arith.constant 0 : index
    %11 = vector.load %arg5[%c0_9, %c0_10] : memref<1x256xf32, #tpu.memory_space<vmem>>, vector<1x256xf32>
    %12 = vector.broadcast %11 : vector<1x256xf32> to vector<8x256xf32>
    %13 = arith.addf %10, %12 : vector<8x256xf32>
    %cst_11 = arith.constant 0.000000e+00 : f32
    %14 = vector.broadcast %cst_11 : f32 to vector<8x256xf32>
    %15 = arith.maximumf %13, %14 : vector<8x256xf32>
    %16 = arith.truncf %15 : vector<8x256xf32> to vector<8x256xbf16>
    %c0_12 = arith.constant 0 : index
    %c0_13 = arith.constant 0 : index
    %17 = vector.load %arg6[%c0_12, %c0_13] : memref<256x128xbf16, #tpu.memory_space<vmem>>, vector<256x128xbf16>
    %cst_14 = arith.constant dense<0.000000e+00> : vector<8x128xf32>
    %18 = tpu.matmul %16, %17, %cst_14 {dimension_numbers = #tpu.dot_dimension_numbers<[1], [0], [0], [1], [0, 0, 1, 1], [], []>} : vector<8x256xbf16>, vector<256x128xbf16>, vector<8x128xf32> -> vector<8x128xf32>
    %c0_15 = arith.constant 0 : index
    %c0_16 = arith.constant 0 : index
    %19 = vector.load %arg7[%c0_15, %c0_16] : memref<1x128xf32, #tpu.memory_space<vmem>>, vector<1x128xf32>
    %20 = vector.broadcast %19 : vector<1x128xf32> to vector<8x128xf32>
    %21 = arith.addf %18, %20 : vector<8x128xf32>
    %cst_17 = arith.constant dense<0xFF800000> : vector<8xf32>
    %22 = vector.multi_reduction <maximumf>, %21, %cst_17 [1] : vector<8x128xf32> to vector<8xf32>
    %23 = vector.shape_cast %22 : vector<8xf32> to vector<8x1xf32>
    %24 = vector.broadcast %23 : vector<8x1xf32> to vector<8x128xf32>
    %25 = arith.subf %21, %24 : vector<8x128xf32>
    %26 = math.exp %25 : vector<8x128xf32>
    %cst_18 = arith.constant dense<0.000000e+00> : vector<8xf32>
    %27 = vector.multi_reduction <add>, %26, %cst_18 [1] : vector<8x128xf32> to vector<8xf32>
    %28 = vector.shape_cast %27 : vector<8xf32> to vector<8x1xf32>
    %29 = tpu.reciprocal %28 {approx = true} : vector<8x1xf32> -> vector<8x1xf32>
    %30 = vector.broadcast %29 : vector<8x1xf32> to vector<8x128xf32>
    %31 = arith.mulf %26, %30 : vector<8x128xf32>
    %c0_19 = arith.constant 0 : index
    %c0_20 = arith.constant 0 : index
    %32 = vector.load %arg8[%c0_19, %c0_20] : memref<8x128xf32, #tpu.memory_space<vmem>>, vector<8x128xf32>
    tpu.vector_store %arg8[%c0_19, %c0_20], %31 {strides = array<i32>} : memref<8x128xf32, #tpu.memory_space<vmem>>, vector<8x128xf32>,
    return
  }
  func.func @transform_0(%arg0: i32) -> (i32, i32) {
    %c0_i32 = arith.constant 0 : i32
    %c0_i32_0 = arith.constant 0 : i32
    return %arg0, %c0_i32 : i32, i32
  }
  func.func @transform_1(%arg0: i32) -> (i32, i32) {
    %c0_i32 = arith.constant 0 : i32
    %c0_i32_0 = arith.constant 0 : i32
    %c0_i32_1 = arith.constant 0 : i32
    return %c0_i32, %c0_i32_0 : i32, i32
  }
  func.func @transform_2(%arg0: i32) -> (i32, i32) {
    %c0_i32 = arith.constant 0 : i32
    %c0_i32_0 = arith.constant 0 : i32
    %c0_i32_1 = arith.constant 0 : i32
    return %c0_i32, %c0_i32_0 : i32, i32
  }
  func.func @transform_3(%arg0: i32) -> (i32, i32) {
    %c0_i32 = arith.constant 0 : i32
    %c0_i32_0 = arith.constant 0 : i32
    %c0_i32_1 = arith.constant 0 : i32
    return %c0_i32, %c0_i32_0 : i32, i32
  }
  func.func @transform_4(%arg0: i32) -> (i32, i32) {
    %c0_i32 = arith.constant 0 : i32
    %c0_i32_0 = arith.constant 0 : i32
    %c0_i32_1 = arith.constant 0 : i32
    return %c0_i32, %c0_i32_0 : i32, i32
  }
  func.func @transform_5(%arg0: i32) -> (i32, i32) {
    %c0_i32 = arith.constant 0 : i32
    %c0_i32_0 = arith.constant 0 : i32
    %c0_i32_1 = arith.constant 0 : i32
    return %c0_i32, %c0_i32_0 : i32, i32
  }
  func.func @transform_6(%arg0: i32) -> (i32, i32) {
    %c0_i32 = arith.constant 0 : i32
    %c0_i32_0 = arith.constant 0 : i32
    %c0_i32_1 = arith.constant 0 : i32
    return %c0_i32, %c0_i32_0 : i32, i32
  }
  func.func @transform_7(%arg0: i32) -> (i32, i32) {
    %c0_i32 = arith.constant 0 : i32
    %c0_i32_0 = arith.constant 0 : i32
    return %arg0, %c0_i32 : i32, i32
  }
}

</mosaic_0001>

<bundles_post_ra>
// kernel: tpu_custom_call.1
= control target key start
LH: loop header
LB: loop body
LE: loop exit
PB: predicated region body
PF: predicated region fallthrough
CT: control target
= control target key end

     0   :  { %12 = vsyncpa [#allocation3], 0  ;;  %s1983_s0 = inlined_call_operand.hbm [shape: bf16[16,256], index: 0, kind: input, shape index: {}]   ;;  %s1984_s1 = inlined_call_operand.hbm [shape: bf16[256,256], index: 1, kind: input, shape index: {}]   ;;  %s1985_s2 = inlined_call_operand.vmem [shape: f32[1,256], index: 2, kind: input, shape index: {}]   ;;  %s1986_s3 = inlined_call_operand.hbm [shape: bf16[256,256], index: 3, kind: input, shape index: {}]   ;;  %s1987_s4 = inlined_call_operand.vmem [shape: f32[1,256], index: 4, kind: input, shape index: {}]   ;;  %s1988_s5 = inlined_call_operand.hbm [shape: bf16[256,128], index: 5, kind: input, shape index: {}]   ;;  %s1989_s6 = inlined_call_operand.vmem [shape: f32[1,128], index: 6, kind: input, shape index: {}]   ;;  %s1990_s7 = inlined_call_operand.hbm [shape: f32[16,128], index: 7, kind: output, shape index: {}]  }
   0x1   :  { %14 = vsyncpa [#allocation3 + $0x1], 0 }
   0x2   :  { %15 = vsyncpa [#allocation6], 0 }
   0x3   :  { %16 = vsyncpa [#allocation9], 0 }
   0x4   :  { %17 = vsyncpa [#allocation4], 0 }
   0x5   :  { %19 = vsyncpa [#allocation4 + $0x1], 0  ;;  %s1707_s24 = smov 0   ;;  %s1709_s25 = smov 0  }
   0x6   :  { %s1711_s26 = smov 0   ;;  %s1713_s27 = smov 0  }
   0x7 LB: > { %s1728_s28 = sadd.s32 4294967295, %s1656_s27   ;;  %s1144_s29 = sadd.s32 4294967294, %s1656_s27   ;;  %s1656_s27 = sphi %s1713_s27, %s2016_s27   ;;  %s1652_s26 = sphi %s1711_s26, %s2015_s26   ;;  %s1648_s25 = sphi %s1709_s25, %s2014_s25   ;;  %s1644_s24 = sphi %s1707_s24, %s2013_s24  }
   0x8   : > { %p45_p0 = scmp.ne.s32.totalorder %s1648_s25, %s1644_s24  ;;  %p1991_p1 = scmp.eq.s32.totalorder %s1728_s28, 0 }
   0x9   : > { %p201_p3 = scmp.eq.s32.totalorder %s1144_s29, 1  ;;  %p1145_p5 = scmp.ge.s32.totalorder %s1656_s27, 1 }
   0xa   : > { %p1737_p4 = por %p1991_p1, %p45_p0  ;;  %p208_p7 = scmp.lt.s32.totalorder %s1656_s27, 3 }
   0xb   : > { %p1742_p6 = por %p201_p3, %p45_p0  ;;  %s1658_s10 = smov [#allocation5]  }
   0xc   : > { %s1995_s30 = scalar_select %p1737_p4, 1, 0 }
   0xd   : > { %s1996_s8 = scalar_select %p1742_p6, 1, 0 }
   0xe   : > { %p1747_p8 = pnand %p1145_p5, %p208_p7  ;;  %s220_s11 = sshll.u32 %s1658_s10, 4  ;;  %s1751_s11 = int_to_ptr.vmem [resolvable:$true] %s220_s11 }
   0xf   : > { %1997 = sst [smem:[#allocation15_spill]] %s1996_s8  ;;  %s1659_s13 = smov [#allocation7]  }
  0x10   : > { %s1998_s9 = scalar_select %p1747_p8, 1, 0 }
  0x11   : > { %p1285_p9 = pneg %p1747_p8  ;;  %s236_s14 = sshll.u32 %s1659_s13, 4  ;;  %s1762_s14 = int_to_ptr.vmem [resolvable:$true] %s236_s14 }
  0x12   : > { %s1660_s15 = smov [#allocation8]   ;;  %s1468_s19 = scalar_lea.hbm %s1984_s1, 4096 }
  0x13   : > { %p1758_p11 = pnand %p1285_p9, %p1991_p1  ;;  %s1764_s16 = sshll.u32 %s1660_s15, 4  ;;  %s253_s16 = int_to_ptr.vmem [resolvable:$true] %s1764_s16 }
  0x14   : > { %p1469_p12 = scmp.ne.s32.totalorder %s1984_s1, %s1468_s19  ;;  %p1475_p5 = scmp.lt.u32.totalorder %s1468_s19, %s1984_s1 }
  0x15   : > { %p1774_p13 = pneg %p1758_p11 }
  0x17   : > { %p1471_p0 = pnand %p1774_p13, %p1469_p12 }
  0x19   : > { %p1472_p3 = pneg %p1471_p0 }
  0x1b   : > { %p1477_p7 = pnand %p1475_p5, %p1472_p3 }
  0x1d   : > { %1480 = shalt.err (!%p1477_p7)
}
  0x1e   : > { %s1481_s10 = scalar_lea.vmem %s1751_s11, 4096  ;;  %p1489_p2 = scmp.lt.s32.totalorder %s1751_s11, %s1751_s11 }
  0x1f   : > { %p1482_p9 = scmp.ne.s32.totalorder %s1751_s11, %s1481_s10  ;;  %p1490_p6 = scmp.lt.s32.totalorder %s1481_s10, %s1481_s10 }
  0x21   : > { %p1484_p10 = pnand %p1482_p9, %p1774_p13  ;;  %p1491_p12 = por %p1490_p6, %p1489_p2 }
  0x23   : > { %p1485_p1 = pneg %p1484_p10 }
  0x25   : > { %p1492_p0 = pnand %p1491_p12, %p1485_p1 }
  0x27   : > { %1495 = shalt.err (!%p1492_p0)
}
  0x28   : > { %s1661_s13 = smov 128   ;;  %s1662_s15 = smov 8  }
  0x29   : > { %1288 = dma.hbm_to_vmem [thread:$0]  (!%p1758_p11), %s1984_s1, 4096, %s1751_s11, [#allocation6], %s1661_s13, %s1661_s13, %s1662_s15  }
  0x2a   : > { %s1496_s21 = scalar_lea.hbm %s1986_s3, 4096 }
  0x2b   : > { %p1497_p2 = scmp.ne.s32.totalorder %s1986_s3, %s1496_s21  ;;  %p1503_p10 = scmp.lt.u32.totalorder %s1496_s21, %s1986_s3 }
  0x2d   : > { %p1499_p1 = pnand %p1497_p2, %p1774_p13 }
  0x2f   : > { %p1500_p6 = pneg %p1499_p1 }
  0x31   : > { %p1505_p3 = pnand %p1503_p10, %p1500_p6 }
  0x33   : > { %1508 = shalt.err (!%p1505_p3)
}
  0x34   : > { %s1509_s11 = scalar_lea.vmem %s1762_s14, 4096  ;;  %p1517_p12 = scmp.lt.s32.totalorder %s1762_s14, %s1762_s14 }
  0x35   : > { %p1510_p5 = scmp.ne.s32.totalorder %s1762_s14, %s1509_s11  ;;  %p1518_p0 = scmp.lt.s32.totalorder %s1509_s11, %s1509_s11 }
  0x37   : > { %p1512_p7 = pnand %p1510_p5, %p1774_p13  ;;  %p1519_p2 = por %p1518_p0, %p1517_p12 }
  0x39   : > { %p1513_p9 = pneg %p1512_p7 }
  0x3b   : > { %p1520_p1 = pnand %p1519_p2, %p1513_p9 }
  0x3d   : > { %1523 = shalt.err (!%p1520_p1)
}
  0x3e   : > { %1291 = dma.hbm_to_vmem [thread:$0]  (!%p1758_p11), %s1986_s3, 4096, %s1762_s14, [#allocation6], %s1661_s13, %s1661_s13, %s1662_s15  }
  0x3f   : > { %s1524_s20 = scalar_lea.hbm %s1988_s5, 2048 }
  0x40   : > { %p1525_p6 = scmp.ne.s32.totalorder %s1988_s5, %s1524_s20  ;;  %p1531_p5 = scmp.lt.u32.totalorder %s1524_s20, %s1988_s5 }
  0x42   : > { %p1527_p10 = pnand %p1525_p6, %p1774_p13 }
  0x44   : > { %p1528_p3 = pneg %p1527_p10 }
  0x46   : > { %p1533_p7 = pnand %p1531_p5, %p1528_p3 }
  0x48   : > { %1536 = shalt.err (!%p1533_p7)
}
  0x49   : > { %s1537_s11 = scalar_lea.vmem %s253_s16, 2048  ;;  %p1545_p2 = scmp.lt.s32.totalorder %s253_s16, %s253_s16 }
  0x4a   : > { %p1538_p9 = scmp.ne.s32.totalorder %s253_s16, %s1537_s11  ;;  %p1546_p1 = scmp.lt.s32.totalorder %s1537_s11, %s1537_s11 }
  0x4c   : > { %p1540_p12 = pnand %p1538_p9, %p1774_p13  ;;  %p1547_p4 = por %p1546_p1, %p1545_p2 }
  0x4e   : > { %p1541_p0 = pneg %p1540_p12 }
  0x50   : > { %p1548_p8 = pnand %p1547_p4, %p1541_p0 }
  0x52   : > { %1551 = shalt.err (!%p1548_p8)
}
  0x53   : > { %s1663_s14 = smov 64   ;;  %s1664_s22 = smov 4  }
  0x54   : > { %1294 = dma.hbm_to_vmem [thread:$0]  (!%p1758_p11), %s1988_s5, 2048, %s253_s16, [#allocation9], %s1663_s14, %s1663_s14, %s1664_s22  }
  0x55   : > { %s1838_s8 = sadd.s32 1, %s1656_s27   ;;  %s32_s18 = sadd.s32 1, %s1652_s26 }
  0x56   : > { %s29_s17 = ssub.s32 %s1656_s27, %s1838_s8  ;;  %p39_p8 = scmp.ne.s32.totalorder %s1652_s26, %s1648_s25 }
  0x57   : > { %p30_p4 = scmp.eq.s32.totalorder %s29_s17, 0  ;;  %p40_p13 = scmp.eq.s32.totalorder %s1656_s27, 0 }
  0x58   : > { %p1306_p6 = scmp.lt.s32.totalorder %s1656_s27, 2  ;;  %p2001_p3 = scmp.eq.s32.totalorder %s1728_s28, 1 }
  0x59   : > { %s1848_s19 = scalar_select %p30_p4, %s1652_s26, %s32_s18  }
  0x5a   : > { %p41_p10 = por %p40_p13, %p39_p8  ;;  %p1852_p5 = por %p2001_p3, %p39_p8 }
  0x5b   : > { %s269_s12 = sand.u32 1, %s1652_s26   ;;  %s1246_s21 = sshll.u32 %s1656_s27, 7 }
  0x5c   : > { %s1150_s16 = sshll.u32 %s269_s12, 3  ;;  %s1861_s10 = scalar_lea.hbm %s1983_s0, %s1246_s21 }
  0x5d   : > { %s273_s11 = scalar_lea.vmem [#allocation2], %s1150_s16  ;;  %p1863_p11 = pnand %p1306_p6, %p41_p10 }
  0x5e   : > { %s281_s14 = sshll.u32 %s273_s11, 4  ;;  %s270_s13 = scalar_lea.sflag [#allocation3], %s269_s12  ;;  %s1867_s14 = int_to_ptr.vmem [resolvable:$true] %s281_s14 }
  0x5f   : > { %s1552_s15 = scalar_lea.hbm %s1861_s10, 128  ;;  %p1554_p9 = pneg %p1863_p11 }
  0x60   : > { %p1553_p7 = scmp.ne.s32.totalorder %s1861_s10, %s1552_s15  ;;  %s1557_s21 = scalar_lea.hbm %s1983_s0, 256 }
  0x61   : > { %p1558_p2 = scmp.lt.u32.totalorder %s1861_s10, %s1983_s0  ;;  %p1559_p1 = scmp.lt.u32.totalorder %s1557_s21, %s1552_s15 }
  0x62   : > { %p1555_p12 = pnand %p1554_p9, %p1553_p7  ;;  %p1561_p8 = scmp.lt.u32.totalorder %s1552_s15, %s1861_s10 }
  0x63   : > { %p1560_p4 = por %p1559_p1, %p1558_p2 }
  0x64   : > { %p1556_p0 = pneg %p1555_p12 }
  0x65   : > { %p1562_p13 = por %p1561_p8, %p1560_p4 }
  0x67   : > { %p1563_p6 = pnand %p1562_p13, %p1556_p0 }
  0x69   : > { %1566 = shalt.err (!%p1563_p6)
}
  0x6a   : > { %s1567_s12 = scalar_lea.vmem %s1867_s14, 128  ;;  %s1665_s29 = smov [#allocation2]  }
  0x6b   : > { %p1568_p10 = scmp.ne.s32.totalorder %s1867_s14, %s1567_s12  ;;  %s1572_s11 = sshll.u32 %s1665_s29, 4  ;;  %s1573_s11 = int_to_ptr.vmem [resolvable:$false] %s1572_s11 }
  0x6c   : > { %s1574_s17 = scalar_lea.vmem %s1573_s11, 256  ;;  %p1575_p12 = scmp.lt.s32.totalorder %s1867_s14, %s1573_s11 }
  0x6d   : > { %p1570_p3 = pnand %p1568_p10, %p1554_p9  ;;  %p1576_p2 = scmp.lt.s32.totalorder %s1574_s17, %s1567_s12 }
  0x6f   : > { %p1571_p7 = pneg %p1570_p3  ;;  %p1577_p1 = por %p1576_p2, %p1575_p12 }
  0x71   : > { %p1578_p4 = pnand %p1577_p1, %p1571_p7 }
  0x73   : > { %1581 = shalt.err (!%p1578_p4)
}
  0x74   : > { %1298 = dma.hbm_to_vmem [thread:$0]  (!%p1863_p11), %s1861_s10, 128, %s1867_s14, %s270_s13  }
  0x75   : > { %p2004_p0 = scmp.ne.s32.totalorder %s1998_s9, 0 }
  0x76   : > { %s1897_s15 = sand.u32 (!%p2004_p0), 1, %s1648_s25   ;;  %p2005_p9 = scmp.ne.s32.totalorder (!%p2004_p0), %s1995_s30, 0 }
  0x77   : > { %290 = sbr.rel (%p2004_p0) target bundleno = 1182 (0x49e), region = 48  ;;  %s1154_s18 = sshll.u32 (!%p2004_p0), %s1897_s15, 3 }
  0x78   : > { %s293_s21 = scalar_lea.sflag (!%p2004_p0), [#allocation3], %s1897_s15  ;;  %s1903_s16 = scalar_lea.vmem (!%p2004_p0), [#allocation2], %s1154_s18 }
  0x7e   : > { %1627 = dma.done.wait (%p2005_p9), %s293_s21, 128  }
  0x7f   : > { %1629 = vsyncadd (%p2005_p9), %s293_s21, 4294967168  ;;  %p2006_p11 = scmp.eq.s32.totalorder %s1728_s28, 0 }
  0x81   : > { %1631 = dma.done.wait (%p2006_p11), [#allocation6], 8192   ;;  %p2007_p8 = pmov %p2006_p11 }
  0x83   : > { %1633 = vsyncadd (%p2007_p8), [#allocation6], 4294959104  ;;  %p2008_p13 = pmov %p2007_p8 }
  0x84   : > { %p2009_p6 = pmov %p2007_p8 }
  0x85   : > { %1635 = dma.done.wait (%p2008_p13), [#allocation9], 2048  }
  0x86   : > { %1637 = vsyncadd (%p2009_p6), [#allocation9], 4294965248  ;;  %v1350_v0 = vld [vmem:[#allocation5 + $0x4] ss:$8 sps:$4 sm:$0xff]   ;;  %v1352_v1 = vld [vmem:[#allocation5] ss:$8 sps:$4 sm:$0xff]  }
  0x87   : > { %552 = vmatprep.subr.bf16.mxu0 %v1350_v0  ;;  %v1353_v2 = vld [vmem:[#allocation5 + $0x14] ss:$8 sps:$4 sm:$0xff]   ;;  %v1355_v3 = vld [vmem:[#allocation5 + $0x10] ss:$8 sps:$4 sm:$0xff]   ;;  %v1356_v4 = vld [vmem:[#allocation5 + $0x24] ss:$8 sps:$4 sm:$0xff]  }
  0x88   : > { %553 = vmatpush1.bf16.msra.mxu0 %v1352_v1  ;;  %v1358_v5 = vld [vmem:[#allocation5 + $0x20] ss:$8 sps:$4 sm:$0xff]   ;;  %v1359_v6 = vld [vmem:[#allocation5 + $0x34] ss:$8 sps:$4 sm:$0xff]   ;;  %v1361_v7 = vld [vmem:[#allocation5 + $0x30] ss:$8 sps:$4 sm:$0xff]  }
  0x89   : > { %554 = vmatprep.subr.bf16.mxu0 %v1353_v2  ;;  %v1362_v8 = vld [vmem:[#allocation5 + $0x44] ss:$8 sps:$4 sm:$0xff]   ;;  %v1364_v9 = vld [vmem:[#allocation5 + $0x40] ss:$8 sps:$4 sm:$0xff]   ;;  %v1365_v10 = vld [vmem:[#allocation5 + $0x54] ss:$8 sps:$4 sm:$0xff]  }
  0x8a   : > { %v1367_v11 = vld [vmem:[#allocation5 + $0x50] ss:$8 sps:$4 sm:$0xff]   ;;  %v1368_v12 = vld [vmem:[#allocation5 + $0x64] ss:$8 sps:$4 sm:$0xff]   ;;  %v1370_v13 = vld [vmem:[#allocation5 + $0x60] ss:$8 sps:$4 sm:$0xff]  }
  0x8b   : > { %v1918_v14 = vld [vmem:[%s1903_s16] sm:$0xff]  ;;  %v1400_v16 = vld [vmem:[#allocation7 + $0x4] ss:$8 sps:$4 sm:$0xff]   ;;  %v1402_v17 = vld [vmem:[#allocation7] ss:$8 sps:$4 sm:$0xff]   ;;  %s1243_s23 = sshll.u32 %s1728_s28, 7 }
  0x8c   : > { %555 = vmatpush1.bf16.msra.mxu0 %v1355_v3  ;;  %v1160_v15 = vcombine.high %v1918_v14, %v1918_v14  ;;  %v1403_v18 = vld [vmem:[#allocation7 + $0x14] ss:$8 sps:$4 sm:$0xff]   ;;  %801 = vmatprep.subr.bf16.mxu1 %v1400_v16  ;;  %v1373_v20 = vld [vmem:[#allocation5 + $0x70] ss:$8 sps:$4 sm:$0xff]   ;;  %v1406_v22 = vld [vmem:[#allocation7 + $0x24] ss:$8 sps:$4 sm:$0xff]   ;;  %v1159_v55 = vcombine.low %v1918_v14, %v1918_v14  ;;  %s1939_s21 = scalar_lea.hbm %s1990_s7, %s1243_s23 }
  0x8d   : > { %556 = vmatprep.subr.bf16.mxu0 %v1356_v4  ;;  %v1371_v19 = vld [vmem:[#allocation5 + $0x74] ss:$8 sps:$4 sm:$0xff]   ;;  %802 = vmatpush1.bf16.msra.mxu1 %v1402_v17  ;;  %v1405_v21 = vld [vmem:[#allocation7 + $0x10] ss:$8 sps:$4 sm:$0xff]   ;;  %v1374_v23 = vld [vmem:[#allocation5 + $0x84] ss:$8 sps:$4 sm:$0xff]  }
  0x8e   : > { %584 = vmatprep.mubr.bf16.mxu0 %v1160_v15  ;;  %803 = vmatprep.subr.bf16.mxu1 %v1403_v18  ;;  %v1376_v24 = vld [vmem:[#allocation5 + $0x80] ss:$8 sps:$4 sm:$0xff]   ;;  %v1409_v26 = vld [vmem:[#allocation7 + $0x34] ss:$8 sps:$4 sm:$0xff]   ;;  %v1379_v28 = vld [vmem:[#allocation5 + $0x90] ss:$8 sps:$4 sm:$0xff]   ;;  %v375_v15 = vlaneseq }
  0x8f   : > { %v1408_v25 = vld [vmem:[#allocation7 + $0x20] ss:$8 sps:$4 sm:$0xff]   ;;  %v1377_v27 = vld [vmem:[#allocation5 + $0x94] ss:$8 sps:$4 sm:$0xff]   ;;  %v1411_v29 = vld [vmem:[#allocation7 + $0x30] ss:$8 sps:$4 sm:$0xff]  }
  0x90   : > { %557 = vmatpush1.bf16.msra.mxu0 %v1358_v5  ;;  %v1412_v30 = vld [vmem:[#allocation7 + $0x44] ss:$8 sps:$4 sm:$0xff]   ;;  %v1382_v32 = vld [vmem:[#allocation5 + $0xa0] ss:$8 sps:$4 sm:$0xff]   ;;  %v1415_v34 = vld [vmem:[#allocation7 + $0x54] ss:$8 sps:$4 sm:$0xff]  }
  0x91   : > { %558 = vmatprep.subr.bf16.mxu0 %v1359_v6  ;;  %804 = vmatpush1.bf16.msra.mxu1 %v1405_v21  ;;  %v1380_v31 = vld [vmem:[#allocation5 + $0xa4] ss:$8 sps:$4 sm:$0xff]   ;;  %v1414_v33 = vld [vmem:[#allocation7 + $0x40] ss:$8 sps:$4 sm:$0xff]   ;;  %v1383_v35 = vld [vmem:[#allocation5 + $0xb4] ss:$8 sps:$4 sm:$0xff]  }
  0x92   : > { %805 = vmatprep.subr.bf16.mxu1 %v1406_v22  ;;  %v1417_v36 = vld [vmem:[#allocation7 + $0x50] ss:$8 sps:$4 sm:$0xff]   ;;  %v1418_v38 = vld [vmem:[#allocation7 + $0x64] ss:$8 sps:$4 sm:$0xff]   ;;  %v1420_v40 = vld [vmem:[#allocation7 + $0x60] ss:$8 sps:$4 sm:$0xff]  }
  0x93   : > { %v1385_v37 = vld [vmem:[#allocation5 + $0xb0] ss:$8 sps:$4 sm:$0xff]   ;;  %v1386_v39 = vld [vmem:[#allocation5 + $0xc4] ss:$8 sps:$4 sm:$0xff]   ;;  %v1388_v41 = vld [vmem:[#allocation5 + $0xc0] ss:$8 sps:$4 sm:$0xff]  }
  0x94   : > { %559 = vmatpush1.bf16.msra.mxu0 %v1361_v7  ;;  %v1421_v42 = vld [vmem:[#allocation7 + $0x74] ss:$8 sps:$4 sm:$0xff]   ;;  %v1423_v44 = vld [vmem:[#allocation7 + $0x70] ss:$8 sps:$4 sm:$0xff]   ;;  %v1424_v46 = vld [vmem:[#allocation7 + $0x84] ss:$8 sps:$4 sm:$0xff]  }
  0x95   : > { %560 = vmatprep.subr.bf16.mxu0 %v1362_v8  ;;  %806 = vmatpush1.bf16.msra.mxu1 %v1408_v25  ;;  %v1389_v43 = vld [vmem:[#allocation5 + $0xd4] ss:$8 sps:$4 sm:$0xff]   ;;  %v1391_v45 = vld [vmem:[#allocation5 + $0xd0] ss:$8 sps:$4 sm:$0xff]   ;;  %v1392_v47 = vld [vmem:[#allocation5 + $0xe4] ss:$8 sps:$4 sm:$0xff]  }
  0x96   : > { %807 = vmatprep.subr.bf16.mxu1 %v1409_v26  ;;  %v1426_v48 = vld [vmem:[#allocation7 + $0x80] ss:$8 sps:$4 sm:$0xff]   ;;  %v1427_v50 = vld [vmem:[#allocation7 + $0x94] ss:$8 sps:$4 sm:$0xff]   ;;  %v1429_v52 = vld [vmem:[#allocation7 + $0x90] ss:$8 sps:$4 sm:$0xff]  }
  0x97   : > { %v1394_v49 = vld [vmem:[#allocation5 + $0xe0] ss:$8 sps:$4 sm:$0xff]   ;;  %v1395_v51 = vld [vmem:[#allocation5 + $0xf4] ss:$8 sps:$4 sm:$0xff]   ;;  %v1397_v53 = vld [vmem:[#allocation5 + $0xf0] ss:$8 sps:$4 sm:$0xff]  }
  0x98   : > { %561 = vmatpush1.bf16.msra.mxu0 %v1364_v9  ;;  %v1430_v54 = vld [vmem:[#allocation7 + $0xa4] ss:$8 sps:$4 sm:$0xff]   ;;  %v1432_v56 = vld [vmem:[#allocation7 + $0xa0] ss:$8 sps:$4 sm:$0xff]   ;;  %v1433_v57 = vld [vmem:[#allocation7 + $0xb4] ss:$8 sps:$4 sm:$0xff]  }
  0x99   : > { %562 = vmatprep.subr.bf16.mxu0 %v1365_v10  ;;  %808 = vmatpush1.bf16.msra.mxu1 %v1411_v29  ;;  %v1435_v58 = vld [vmem:[#allocation7 + $0xb0] ss:$8 sps:$4 sm:$0xff]   ;;  %v1436_v59 = vld [vmem:[#allocation7 + $0xc4] ss:$8 sps:$4 sm:$0xff]   ;;  %v1438_v60 = vld [vmem:[#allocation7 + $0xc0] ss:$8 sps:$4 sm:$0xff]  }
  0x9a   : > { %809 = vmatprep.subr.bf16.mxu1 %v1412_v30  ;;  %v1439_v61 = vld [vmem:[#allocation7 + $0xd4] ss:$8 sps:$4 sm:$0xff]   ;;  %v1441_v62 = vld [vmem:[#allocation7 + $0xd0] ss:$8 sps:$4 sm:$0xff]   ;;  %v1442_v63 = vld [vmem:[#allocation7 + $0xe4] ss:$8 sps:$4 sm:$0xff]  }
  0x9b   : > { %v1444_v0 = vld [vmem:[#allocation7 + $0xe0] ss:$8 sps:$4 sm:$0xff]   ;;  %v1445_v1 = vld [vmem:[#allocation7 + $0xf4] ss:$8 sps:$4 sm:$0xff]   ;;  %v1447_v2 = vld [vmem:[#allocation7 + $0xf0] ss:$8 sps:$4 sm:$0xff]  }
  0x9c   : > { %563 = vmatpush1.bf16.msra.mxu0 %v1367_v11  ;;  %v1448_v3 = vld [vmem:[#allocation8 + $0x40] sm:$0xff]   ;;  %v1450_v5 = vld [vmem:[#allocation8 + $0x48] sm:$0xff]   ;;  %v1452_v7 = vld [vmem:[#allocation8 + $0x50] sm:$0xff]   ;;  %v376_v16 = vshrl.u32 %v375_v15, 7  ;;  %s338_s12 = scalar_lea.vmem [#allocation10], %s1154_s18  ;;  %s1032_s16 = scalar_lea.sflag [#allocation4], %s1897_s15 }
  0x9d   : > { %564 = vmatprep.subr.bf16.mxu0 %v1368_v12  ;;  %810 = vmatpush1.bf16.msra.mxu1 %v1414_v33  ;;  %v1449_v4 = vld [vmem:[#allocation8] sm:$0xff]   ;;  %v1451_v6 = vld [vmem:[#allocation8 + $0x8] sm:$0xff]   ;;  %v1453_v8 = vld [vmem:[#allocation8 + $0x10] sm:$0xff]   ;;  %s1045_s29 = sshll.u32 %s338_s12, 4  ;;  %s1666_s28 = smov [#allocation10]   ;;  %s1941_s29 = int_to_ptr.vmem [resolvable:$true] %s1045_s29 }
  0x9e   : > { %811 = vmatprep.subr.bf16.mxu1 %v1415_v34  ;;  %v1454_v9 = vld [vmem:[#allocation8 + $0x58] sm:$0xff]   ;;  %v1456_v11 = vld [vmem:[#allocation8 + $0x60] sm:$0xff]   ;;  %v1459_v14 = vld [vmem:[#allocation8 + $0x28] sm:$0xff]   ;;  %v377_v17 = vsub.s32 0, %v376_v16  ;;  %s1582_s30 = scalar_lea.vmem %s1941_s29, 128  ;;  %s1586_s18 = sshll.u32 %s1666_s28, 4  ;;  %s1587_s18 = int_to_ptr.vmem [resolvable:$false] %s1586_s18 }
  0x9f   : > { %v1455_v10 = vld [vmem:[#allocation8 + $0x18] sm:$0xff]   ;;  %v1457_v12 = vld [vmem:[#allocation8 + $0x20] sm:$0xff]   ;;  %v373_v18 = vld [vmem:[%s1985_s2] sm:$0x3]  ;;  %p1583_p10 = scmp.ne.s32.totalorder %s1941_s29, %s1582_s30  ;;  %s1588_s9 = scalar_lea.vmem %s1587_s18, 256 }
  0xa0   : > { %565 = vmatpush1.bf16.msra.mxu0 %v1370_v13  ;;  %v1458_v13 = vld [vmem:[#allocation8 + $0x68] sm:$0xff]   ;;  %v1461_v33 = vld [vmem:[#allocation8 + $0x30] sm:$0xff]   ;;  %v1462_v34 = vld [vmem:[#allocation8 + $0x78] sm:$0xff]   ;;  %p1589_p12 = scmp.lt.s32.totalorder %s1941_s29, %s1587_s18  ;;  %p1590_p2 = scmp.lt.s32.totalorder %s1588_s9, %s1582_s30 }
  0xa1   : > { %566 = vmatprep.subr.bf16.mxu0 %v1371_v19  ;;  %812 = vmatpush1.bf16.msra.mxu1 %v1417_v36  ;;  %v381_v19 = vsub.s32 1, %v376_v16  ;;  %v629_v36 = vld [vmem:[%s1987_s4] sm:$0x3]  ;;  %p1584_p3 = pnand %p1583_p10, %p1852_p5 }
  0xa2   : > { %813 = vmatprep.subr.bf16.mxu1 %v1418_v38  ;;  %p1591_p1 = por %p1590_p2, %p1589_p12 }
  0xa3   : > { %v382_v21 = vrot.slane %v373_v18, %v381_v19  ;;  %v638_v38 = vrot.slane %v629_v36, %v381_v19  ;;  %p1585_p7 = pneg %p1584_p3 }
  0xa4   : > { %567 = vmatpush1.bf16.msra.mxu0 %v1373_v20  ;;  %v378_v20 = vrot.slane %v373_v18, %v377_v17 }
  0xa5   : > { %568 = vmatprep.subr.bf16.mxu0 %v1374_v23  ;;  %814 = vmatpush1.bf16.msra.mxu1 %v1420_v40  ;;  %p1592_p4 = pnand %p1591_p1, %p1585_p7 }
  0xa6   : > { %815 = vmatprep.subr.bf16.mxu1 %v1421_v42 }
  0xa8   : > { %569 = vmatpush1.bf16.msra.mxu0 %v1376_v24 }
  0xa9   : > { %570 = vmatprep.subr.bf16.mxu0 %v1377_v27  ;;  %816 = vmatpush1.bf16.msra.mxu1 %v1423_v44 }
  0xaa   : > { %817 = vmatprep.subr.bf16.mxu1 %v1424_v46 }
  0xac   : > { %571 = vmatpush1.bf16.msra.mxu0 %v1379_v28 }
  0xad   : > { %572 = vmatprep.subr.bf16.mxu0 %v1380_v31  ;;  %818 = vmatpush1.bf16.msra.mxu1 %v1426_v48 }
  0xae   : > { %819 = vmatprep.subr.bf16.mxu1 %v1427_v50 }
  0xb0   : > { %573 = vmatpush1.bf16.msra.mxu0 %v1382_v32  ;;  %v1460_v32 = vld [vmem:[#allocation8 + $0x70] sm:$0xff]  }
  0xb1   : > { %574 = vmatprep.subr.bf16.mxu0 %v1383_v35  ;;  %820 = vmatpush1.bf16.msra.mxu1 %v1429_v52  ;;  %v1463_v35 = vld [vmem:[#allocation8 + $0x38] sm:$0xff]  }
  0xb2   : > { %821 = vmatprep.subr.bf16.mxu1 %v1430_v54 }
  0xb4   : > { %575 = vmatpush1.bf16.msra.mxu0 %v1385_v37  ;;  %v634_v37 = vrot.slane %v629_v36, %v377_v17 }
  0xb5   : > { %576 = vmatprep.subr.bf16.mxu0 %v1386_v39  ;;  %822 = vmatpush1.bf16.msra.mxu1 %v1432_v56 }
  0xb6   : > { %823 = vmatprep.subr.bf16.mxu1 %v1433_v57 }
  0xb8   : > { %577 = vmatpush1.bf16.msra.mxu0 %v1388_v41 }
  0xb9   : > { %578 = vmatprep.subr.bf16.mxu0 %v1389_v43  ;;  %824 = vmatpush1.bf16.msra.mxu1 %v1435_v58 }
  0xba   : > { %825 = vmatprep.subr.bf16.mxu1 %v1436_v59 }
  0xbc   : > { %579 = vmatpush1.bf16.msra.mxu0 %v1391_v45 }
  0xbd   : > { %580 = vmatprep.subr.bf16.mxu0 %v1392_v47  ;;  %826 = vmatpush1.bf16.msra.mxu1 %v1438_v60 }
  0xbe   : > { %827 = vmatprep.subr.bf16.mxu1 %v1439_v61 }
  0xc0   : > { %581 = vmatpush1.bf16.msra.mxu0 %v1394_v49 }
  0xc1   : > { %582 = vmatprep.subr.bf16.mxu0 %v1395_v51  ;;  %828 = vmatpush1.bf16.msra.mxu1 %v1441_v62  ;;  %v1225_v51 = vld [vmem:[%s1989_s6] ss:$0 sm:$0xff] }
  0xc2   : > { %829 = vmatprep.subr.bf16.mxu1 %v1442_v63 }
  0xc4   : > { %583 = vmatpush1.bf16.msra.mxu0 %v1397_v53 }
  0xc5   : > { %830 = vmatpush1.bf16.msra.mxu1 %v1444_v0  ;;  %1247 = vmatprep.subr.bf16.mxu0 %v1448_v3 }
  0xc6   : > { %831 = vmatprep.subr.bf16.mxu1 %v1445_v1 }
  0xc7   : > { %585 = vmatmul.mubr.bf16.vlgmr.msra.gmra.mrb[0].mxu0 %v1159_v55 }
  0xc8   : > { %1248 = vmatpush3.bf16.msra.mxu0 %v1449_v4 }
  0xc9   : > { %832 = vmatpush1.bf16.msra.mxu1 %v1447_v2  ;;  %1249 = vmatprep.subr.bf16.mxu0 %v1450_v5 }
  0xcc   : > { %1250 = vmatpush3.bf16.msra.mxu0 %v1451_v6 }
  0xcd   : > { %1251 = vmatprep.subr.bf16.mxu0 %v1452_v7 }
  0xd0   : > { %1252 = vmatpush3.bf16.msra.mxu0 %v1453_v8 }
  0xd1   : > { %1253 = vmatprep.subr.bf16.mxu0 %v1454_v9 }
  0xd4   : > { %1254 = vmatpush3.bf16.msra.mxu0 %v1455_v10 }
  0xd5   : > { %1255 = vmatprep.subr.bf16.mxu0 %v1456_v11 }
  0xd8   : > { %1256 = vmatpush3.bf16.msra.mxu0 %v1457_v12 }
  0xd9   : > { %1257 = vmatprep.subr.bf16.mxu0 %v1458_v13 }
  0xdc   : > { %1258 = vmatpush3.bf16.msra.mxu0 %v1459_v14 }
  0xdd   : > { %1259 = vmatprep.subr.bf16.mxu0 %v1460_v32 }
  0xe0   : > { %1260 = vmatpush3.bf16.msra.mxu0 %v1461_v33 }
  0xe1   : > { %1261 = vmatprep.subr.bf16.mxu0 %v1462_v34 }
  0xe4   : > { %1262 = vmatpush3.bf16.msra.mxu0 %v1463_v35 }
 0x19a   : > { %v586_v22 = vpop.f32.mrb[0].mxu0 }
 0x19b   : > { %v587_v23 = vadd.f32 %v586_v22, %v378_v20  ;;  %v588_v24 = vpop.f32.mrb[1].mxu0 }
 0x19c   : > { %v589_v25 = vadd.f32 %v588_v24, %v382_v21  ;;  %v590_v26 = vpop.f32.mrb[2].mxu0 }
 0x19d   : > { %v593_v27 = vmax.f32 %v587_v23, 0.0  ;;  %v591_v28 = vpop.f32.mrb[3].mxu0 }
 0x19e   : > { %v594_v29 = vmax.f32 %v589_v25, 0.0 }
 0x19f   : > { %v595_v31 = vpack.c.bf16 %v593_v27, %v593_v27 }
 0x1a0   : > { %v596_v30 = vpack.c.bf16 %v594_v29, %v594_v29 }
 0x1a2   : > { %833 = vmatprep.mubr.bf16.mxu1 %v596_v30 }
 0x1a3   : > { %834 = vmatmul.mubr.bf16.vlgmr.msra.gmra.mrb[0].mxu1 %v595_v31 }
 0x276   : > { %v835_v39 = vpop.f32.mrb[0].mxu1 }
 0x277   : > { %v836_v40 = vadd.f32 %v835_v39, %v634_v37  ;;  %v837_v41 = vpop.f32.mrb[1].mxu1 }
 0x278   : > { %v838_v42 = vadd.f32 %v837_v41, %v638_v38  ;;  %v839_v43 = vpop.f32.mrb[2].mxu1 }
 0x279   : > { %v842_v44 = vmax.f32 %v836_v40, 0.0  ;;  %v840_v45 = vpop.f32.mrb[3].mxu1 }
 0x27a   : > { %v843_v46 = vmax.f32 %v838_v42, 0.0 }
 0x27b   : > { %v844_v48 = vpack.c.bf16 %v842_v44, %v842_v44 }
 0x27c   : > { %v845_v47 = vpack.c.bf16 %v843_v46, %v843_v46 }
 0x27e   : > { %1013 = vmatprep.mubr.bf16.mxu0 %v845_v47 }
 0x27f   : > { %1014 = vmatmul.mubr.bf16.vlgmr.msra.gmra.mrb[4].mxu0 %v844_v48 }
 0x352   : > { %v1263_v49 = vpop.f32.mrb[4].mxu0 }
 0x353   : > { %v1264_v50 = vpop.f32.mrb[5].mxu0 }
 0x354   : > { %v1265_v52 = vadd.f32 %v1264_v50, %v1263_v49  ;;  %v1266_v53 = vpop.f32.mrb[6].mxu0 }
 0x355   : > { %v1267_v54 = vpop.f32.mrb[7].mxu0 }
 0x356   : > { %v1016_v55 = vadd.f32 %v1265_v52, %v1225_v51 }
 0x358   : > { %1021 = vmax.xlane.f32.xlu0 %v1016_v55 }
 0x3e5   : > { %v1022_v56 = vpop.xlane.xlu0 %1021 }
 0x3e6   : > { %v1023_v57 = vsub.f32 %v1016_v55, %v1022_v56 }
 0x3e8   : > { %v1024_v58 = vmul.f32 1.442695, %v1023_v57 }
 0x3ea   : > { %1464 = vpow2.f32 %v1024_v58 }
 0x3f4   : > { %v1465_v59 = vpop.eup %1464 }
 0x3f5   : > { %1026 = vadd.xlane.f32.xlu0 %v1465_v59 }
 0x482   : > { %v1027_v60 = vpop.xlane.xlu0 %1026 }
 0x483   : > { %1466 = vrcp.f32 %v1027_v60 }
 0x48d   : > { %v1467_v61 = vpop.eup %1466 }
 0x48e   : > { %v1029_v62 = vmul.f32 %v1467_v61, %v1465_v59 }
 0x490   : > { %1030 = vst [vmem:[%s338_s12] sm:$0xff] %v1029_v62 }
 0x491   : > { %1595 = shalt.err (!%p1592_p4)
}
 0x492   : > { %s1596_s15 = scalar_lea.hbm %s1939_s21, 128  ;;  %s1600_s22 = scalar_lea.hbm %s1990_s7, 256 }
 0x493   : > { %p1597_p0 = scmp.ne.s32.totalorder %s1939_s21, %s1596_s15  ;;  %p1601_p8 = scmp.lt.u32.totalorder %s1939_s21, %s1990_s7 }
 0x494   : > { %p1602_p13 = scmp.lt.u32.totalorder %s1600_s22, %s1596_s15  ;;  %p1604_p10 = scmp.lt.u32.totalorder %s1596_s15, %s1939_s21 }
 0x495   : > { %p1598_p9 = pnand %p1597_p0, %p1852_p5 }
 0x496   : > { %p1603_p6 = por %p1602_p13, %p1601_p8 }
 0x497   : > { %p1599_p11 = pneg %p1598_p9 }
 0x498   : > { %p1605_p3 = por %p1604_p10, %p1603_p6 }
 0x49a   : > { %p1606_p7 = pnand %p1605_p3, %p1599_p11 }
 0x49c   : > { %1609 = shalt.err (!%p1606_p7)
}
 0x49d   : > { %1283 = dma.vmem_to_hbm [thread:$0]  (%p1852_p5), %s1941_s29, 128, %s1939_s21, %s1032_s16  }
 0x49e PF: > { %s2010_s12 = sld [smem:[#allocation15_spill]]  ;;  %s1057_s11 = sand.u32 1, %s1644_s24  }
 0x49f   : > { %p2012_p2 = scmp.ge.s32.totalorder %s1656_s27, 2  ;;  %s1058_s17 = scalar_lea.sflag [#allocation4], %s1057_s11 }
 0x4a4   : > { %p2011_p12 = scmp.ne.s32.totalorder %s2010_s12, 0 }
 0x4a6   : > { %p1300_p1 = pnand %p2012_p2, %p2011_p12 }
 0x4a8   : > { %1639 = dma.done.wait (!%p1300_p1), %s1058_s17, 128  }
 0x4a9   : > { %1641 = vsyncadd (!%p1300_p1), %s1058_s17, 4294967168  ;;  %p22_p4 = scmp.ge.s32.totalorder %s1838_s8, 4   ;;  %s2013_s24 = smov %s1648_s25 }
 0x4aa   : > { %s2014_s25 = smov %s1652_s26  ;;  %s2015_s26 = smov %s1848_s19 }
 0x4ab   : > { %s2016_s27 = smov %s1838_s8  ;;  %24 = sbr.rel (!%p22_p4) target bundleno = 7 (0x7), region = 105 }
 0x4b2   :  { %1063 = vsyncpa [#allocation3], 1 }
 0x4b3   :  { %1065 = vsyncpa [#allocation3 + $0x1], 1 }
 0x4b4   :  { %1066 = vsyncpa [#allocation6], 1 }
 0x4b5   :  { %1067 = vsyncpa [#allocation9], 1 }
 0x4b6   :  { %1068 = vsyncpa [#allocation4], 1 }
 0x4b7   :  { %1070 = vsyncpa [#allocation4 + $0x1], 1 }

</bundles_post_ra>
